<compile_context>
chip_gen: v7x
topology: tpu7x:2x2x1
jax: 0.10.0
libtpu: 0.0.40
codegen_flags: <defaults>
</compile_context>

<pallas_src>
import functools

import jax
import jax.numpy as jnp
from jax.experimental import pallas as pl
from jax.experimental.pallas import tpu as pltpu


def _round_up(x, m):
    return ((x + m - 1) // m) * m


def gaussian_mlp_kernel(x_ref, w0_ref, w1_ref, w2_ref, b_ref, out_ref, *, outputs):
    """One batch tile of the GaussianMLP forward.

    x_ref  : (TB, F)          bf16  (streamed per grid step)
    w*_ref : (in, out)        f32   (VMEM-resident, constant index_map)
    b_ref  : (3, hidden)      f32   (packed biases, VMEM-resident)
    out_ref: (TB, 2*outputs)  f32   lane-packed [mu | softplus(sigma)+1e-6]
    """
    out_dim = 2 * outputs
    x = x_ref[...].astype(jnp.float32)          # bf16 HBM traffic -> f32 math

    b0 = b_ref[0:1, :]
    b1 = b_ref[1:2, :]
    b2 = b_ref[2:3, 0:out_dim]

    # Layer 0: Linear + ReLU
    h = jnp.dot(x, w0_ref[...], preferred_element_type=jnp.float32)
    h = jnp.maximum(h + b0, 0.0)
    # Layer 1: Linear + ReLU
    h = jnp.dot(h, w1_ref[...], preferred_element_type=jnp.float32)
    h = jnp.maximum(h + b1, 0.0)
    # Layer 2 (head): Linear, width 2*outputs
    h = jnp.dot(h, w2_ref[...], preferred_element_type=jnp.float32) + b2

    # F.softplus (beta=1, threshold=20) on the sigma half only, selected with a
    # lane mask so the result is written with one lane-packed store.
    col = jax.lax.broadcasted_iota(jnp.int32, h.shape, dimension=1)
    sp = jnp.where(h > 20.0, h, jnp.log1p(jnp.exp(jnp.minimum(h, 20.0)))) + 1e-6
    out_ref[...] = jnp.where(col >= outputs, sp, h)


def gaussian_mlp_forward(x, params, *, outputs=1, tb_max=4096):
    """params = [(w0, b0), (w1, b1), (w2, b2)]; weights stored (in, out)."""
    (w0, b0), (w1, b1), (w2, b2) = params
    B, F = x.shape
    hidden = w0.shape[1]
    out_dim = 2 * outputs

    # Pack biases into one small VMEM-resident tile (cuts input streams 7 -> 5).
    b_pack = jnp.zeros((3, hidden), jnp.float32)
    b_pack = b_pack.at[0, :].set(b0.reshape(-1).astype(jnp.float32))
    b_pack = b_pack.at[1, :].set(b1.reshape(-1).astype(jnp.float32))
    b_pack = b_pack.at[2, :out_dim].set(b2.reshape(-1).astype(jnp.float32))

    # Memory-bound kernel: halve x's HBM bytes with bf16; weights stay f32
    # (they are tiny and resident, accuracy is free).
    x_bf16 = x.astype(jnp.bfloat16)

    # Batch tile: multiple of 16 (bf16 sublane packing); pad B to a whole grid.
    TB = min(tb_max, _round_up(B, 16))
    pad_B = _round_up(B, TB)
    if pad_B != B:
        x_bf16 = jnp.pad(x_bf16, ((0, pad_B - B), (0, 0)))

    grid = (pad_B // TB,)
    kernel = functools.partial(gaussian_mlp_kernel, outputs=outputs)

    out = pl.pallas_call(
        kernel,
        out_shape=jax.ShapeDtypeStruct((pad_B, out_dim), jnp.float32),
        grid_spec=pltpu.PrefetchScalarGridSpec(
            num_scalar_prefetch=0,
            grid=grid,
            in_specs=[
                pl.BlockSpec((TB, F), lambda i: (i, 0)),            # x: streamed
                pl.BlockSpec((F, hidden), lambda i: (0, 0)),        # w0: resident
                pl.BlockSpec((hidden, hidden), lambda i: (0, 0)),   # w1: resident
                pl.BlockSpec((hidden, out_dim), lambda i: (0, 0)),  # w2: resident
                pl.BlockSpec((3, hidden), lambda i: (0, 0)),        # biases: resident
            ],
            out_specs=pl.BlockSpec((TB, out_dim), lambda i: (i, 0)),
        ),
        compiler_params=pltpu.CompilerParams(
            dimension_semantics=("parallel",)),
    )(x_bf16, w0.astype(jnp.float32), w1.astype(jnp.float32),
      w2.astype(jnp.float32), b_pack)

    out = out[:B]
    return out[:, :outputs], out[:, outputs:]


def init_params(key, inputs, hidden, outputs, n_lin_layers=3):
    """Deterministic PyTorch-style init; weights pre-transposed to (in, out)."""
    dims = [inputs] + [hidden] * (n_lin_layers - 1) + [2 * outputs]
    params = []
    for i in range(n_lin_layers):
        key, kw, kb = jax.random.split(key, 3)
        bound = 1.0 / jnp.sqrt(dims[i])
        w = jax.random.uniform(kw, (dims[i], dims[i + 1]), jnp.float32, -bound, bound)
        b = jax.random.uniform(kb, (dims[i + 1],), jnp.float32, -bound, bound)
        params.append((w, b))
    return params


def reference_forward(x, params, *, outputs=1):
    """Pure-JAX reference (same bf16 cast on x, f32 accumulation)."""
    (w0, b0), (w1, b1), (w2, b2) = params
    hp = jax.lax.Precision.HIGHEST
    xf = x.astype(jnp.bfloat16).astype(jnp.float32)
    h = jnp.maximum(jnp.dot(xf, w0, precision=hp) + b0[None, :], 0.0)
    h = jnp.maximum(jnp.dot(h, w1, precision=hp) + b1[None, :], 0.0)
    h = jnp.dot(h, w2, precision=hp) + b2[None, :]
    mu = h[:, :outputs]
    s = h[:, outputs:]
    sigma = jnp.where(s > 20.0, s, jnp.log1p(jnp.exp(jnp.minimum(s, 20.0)))) + 1e-6
    return mu, sigma


if __name__ == "__main__":
    # GaussianMLP(inputs=16, outputs=1, hidden_layers=32, n_lin_layers=3)
    B, INPUTS, HIDDEN, OUTPUTS = 8, 16, 32, 1

    key = jax.random.PRNGKey(0)
    key, kx = jax.random.split(key)
    x = jax.random.normal(kx, (B, INPUTS), dtype=jnp.float32)
    params = init_params(key, INPUTS, HIDDEN, OUTPUTS, n_lin_layers=3)

    mu, sigma = gaussian_mlp_forward(x, params, outputs=OUTPUTS)
    mu = jax.block_until_ready(mu)
    sigma = jax.block_until_ready(sigma)

    mu_ref, sigma_ref = reference_forward(x, params, outputs=OUTPUTS)
    assert mu.shape == (B, OUTPUTS) and sigma.shape == (B, OUTPUTS)
    assert jnp.allclose(mu, mu_ref, atol=1e-3, rtol=1e-3)
    assert jnp.allclose(sigma, sigma_ref, atol=1e-3, rtol=1e-3)
    assert bool(jnp.all(sigma > 0.0))

    # Second check: non-divisible batch + multi-tile grid (exercises padding,
    # pipelining, and the parallel batch axis).
    key, kx2 = jax.random.split(key)
    x2 = jax.random.normal(kx2, (200, INPUTS), dtype=jnp.float32)
    mu2, sigma2 = gaussian_mlp_forward(x2, params, outputs=OUTPUTS, tb_max=64)
    mu2 = jax.block_until_ready(mu2)
    sigma2 = jax.block_until_ready(sigma2)
    mu2_ref, sigma2_ref = reference_forward(x2, params, outputs=OUTPUTS)
    assert mu2.shape == (200, OUTPUTS) and sigma2.shape == (200, OUTPUTS)
    assert jnp.allclose(mu2, mu2_ref, atol=1e-3, rtol=1e-3)
    assert jnp.allclose(sigma2, sigma2_ref, atol=1e-3, rtol=1e-3)
    assert bool(jnp.all(sigma2 > 0.0))

    print("KERNEL_OK")
</pallas_src>

<mosaic_0001>
module attributes {stable_mosaic.version = 11 : i64} {
  func.func @gaussian_mlp_kernel(%arg0: i32, %arg1: memref<16x16xbf16, #tpu.memory_space<vmem>>, %arg2: memref<16x32xf32, #tpu.memory_space<vmem>>, %arg3: memref<32x32xf32, #tpu.memory_space<vmem>>, %arg4: memref<32x2xf32, #tpu.memory_space<vmem>>, %arg5: memref<3x32xf32, #tpu.memory_space<vmem>>, %arg6: memref<16x2xf32, #tpu.memory_space<vmem>>) attributes {dimension_semantics = [#tpu.dimension_semantics<parallel>], iteration_bounds = array<i64: 1>, scalar_prefetch = 0 : i64, scratch_operands = 0 : i64, tpu.core_type = #tpu.core_type<tc>, window_params = [{transform_indices = @transform_0, window_bounds = array<i64: 16, 16>}, {pipeline_mode = #tpu.pipeline_mode<synchronous>, transform_indices = @transform_1, window_bounds = array<i64: 16, 32>}, {pipeline_mode = #tpu.pipeline_mode<synchronous>, transform_indices = @transform_2, window_bounds = array<i64: 32, 32>}, {pipeline_mode = #tpu.pipeline_mode<synchronous>, transform_indices = @transform_3, window_bounds = array<i64: 32, 2>}, {pipeline_mode = #tpu.pipeline_mode<synchronous>, transform_indices = @transform_4, window_bounds = array<i64: 3, 32>}, {transform_indices = @transform_5, window_bounds = array<i64: 16, 2>}]} {
    %c0 = arith.constant 0 : index
    %c0_0 = arith.constant 0 : index
    %0 = vector.load %arg1[%c0, %c0_0] : memref<16x16xbf16, #tpu.memory_space<vmem>>, vector<16x16xbf16>
    %1 = arith.extf %0 : vector<16x16xbf16> to vector<16x16xf32>
    %c0_1 = arith.constant 0 : index
    %c0_2 = arith.constant 0 : index
    %2 = vector.load %arg5[%c0_1, %c0_2] : memref<3x32xf32, #tpu.memory_space<vmem>>, vector<1x32xf32>
    %c1 = arith.constant 1 : index
    %c0_3 = arith.constant 0 : index
    %3 = vector.load %arg5[%c1, %c0_3] : memref<3x32xf32, #tpu.memory_space<vmem>>, vector<1x32xf32>
    %c2 = arith.constant 2 : index
    %c0_4 = arith.constant 0 : index
    %4 = vector.load %arg5[%c2, %c0_4] : memref<3x32xf32, #tpu.memory_space<vmem>>, vector<1x2xf32>
    %c0_5 = arith.constant 0 : index
    %c0_6 = arith.constant 0 : index
    %5 = vector.load %arg2[%c0_5, %c0_6] : memref<16x32xf32, #tpu.memory_space<vmem>>, vector<16x32xf32>
    %cst = arith.constant dense<0.000000e+00> : vector<16x32xf32>
    %6 = tpu.matmul %1, %5, %cst {dimension_numbers = #tpu.dot_dimension_numbers<[1], [0], [0], [1], [0, 0, 1, 1], [], []>} : vector<16x16xf32>, vector<16x32xf32>, vector<16x32xf32> -> vector<16x32xf32>
    %7 = vector.broadcast %2 : vector<1x32xf32> to vector<16x32xf32>
    %8 = arith.addf %6, %7 : vector<16x32xf32>
    %cst_7 = arith.constant 0.000000e+00 : f32
    %9 = vector.broadcast %cst_7 : f32 to vector<16x32xf32>
    %10 = arith.maximumf %8, %9 : vector<16x32xf32>
    %c0_8 = arith.constant 0 : index
    %c0_9 = arith.constant 0 : index
    %11 = vector.load %arg3[%c0_8, %c0_9] : memref<32x32xf32, #tpu.memory_space<vmem>>, vector<32x32xf32>
    %cst_10 = arith.constant dense<0.000000e+00> : vector<16x32xf32>
    %12 = tpu.matmul %10, %11, %cst_10 {dimension_numbers = #tpu.dot_dimension_numbers<[1], [0], [0], [1], [0, 0, 1, 1], [], []>} : vector<16x32xf32>, vector<32x32xf32>, vector<16x32xf32> -> vector<16x32xf32>
    %13 = vector.broadcast %3 : vector<1x32xf32> to vector<16x32xf32>
    %14 = arith.addf %12, %13 : vector<16x32xf32>
    %cst_11 = arith.constant 0.000000e+00 : f32
    %15 = vector.broadcast %cst_11 : f32 to vector<16x32xf32>
    %16 = arith.maximumf %14, %15 : vector<16x32xf32>
    %c0_12 = arith.constant 0 : index
    %c0_13 = arith.constant 0 : index
    %17 = vector.load %arg4[%c0_12, %c0_13] : memref<32x2xf32, #tpu.memory_space<vmem>>, vector<32x2xf32>
    %cst_14 = arith.constant dense<0.000000e+00> : vector<16x2xf32>
    %18 = tpu.matmul %16, %17, %cst_14 {dimension_numbers = #tpu.dot_dimension_numbers<[1], [0], [0], [1], [0, 0, 1, 1], [], []>} : vector<16x32xf32>, vector<32x2xf32>, vector<16x2xf32> -> vector<16x2xf32>
    %19 = vector.broadcast %4 : vector<1x2xf32> to vector<16x2xf32>
    %20 = arith.addf %18, %19 : vector<16x2xf32>
    %21 = tpu.iota {dimensions = array<i32: 1>} : vector<16x2xi32>
    %cst_15 = arith.constant 2.000000e+01 : f32
    %22 = vector.broadcast %cst_15 : f32 to vector<16x2xf32>
    %23 = arith.cmpf ogt, %20, %22 : vector<16x2xf32>
    %cst_16 = arith.constant 2.000000e+01 : f32
    %24 = vector.broadcast %cst_16 : f32 to vector<16x2xf32>
    %25 = arith.minimumf %20, %24 : vector<16x2xf32>
    %26 = math.exp %25 : vector<16x2xf32>
    %27 = math.log1p %26 : vector<16x2xf32>
    %28 = arith.select %23, %20, %27 : vector<16x2xi1>, vector<16x2xf32>
    %cst_17 = arith.constant 9.99999997E-7 : f32
    %29 = vector.broadcast %cst_17 : f32 to vector<16x2xf32>
    %30 = arith.addf %28, %29 : vector<16x2xf32>
    %c1_i32 = arith.constant 1 : i32
    %31 = vector.broadcast %c1_i32 : i32 to vector<16x2xi32>
    %32 = arith.cmpi sge, %21, %31 : vector<16x2xi32>
    %33 = arith.select %32, %30, %20 : vector<16x2xi1>, vector<16x2xf32>
    %c0_18 = arith.constant 0 : index
    %c0_19 = arith.constant 0 : index
    %34 = vector.load %arg6[%c0_18, %c0_19] : memref<16x2xf32, #tpu.memory_space<vmem>>, vector<16x2xf32>
    tpu.vector_store %arg6[%c0_18, %c0_19], %33 {strides = array<i32>} : memref<16x2xf32, #tpu.memory_space<vmem>>, vector<16x2xf32>,
    return
  }
  func.func @transform_0(%arg0: i32) -> (i32, i32) {
    %c0_i32 = arith.constant 0 : i32
    %c0_i32_0 = arith.constant 0 : i32
    return %arg0, %c0_i32 : i32, i32
  }
  func.func @transform_1(%arg0: i32) -> (i32, i32) {
    %c0_i32 = arith.constant 0 : i32
    %c0_i32_0 = arith.constant 0 : i32
    %c0_i32_1 = arith.constant 0 : i32
    return %c0_i32, %c0_i32_0 : i32, i32
  }
  func.func @transform_2(%arg0: i32) -> (i32, i32) {
    %c0_i32 = arith.constant 0 : i32
    %c0_i32_0 = arith.constant 0 : i32
    %c0_i32_1 = arith.constant 0 : i32
    return %c0_i32, %c0_i32_0 : i32, i32
  }
  func.func @transform_3(%arg0: i32) -> (i32, i32) {
    %c0_i32 = arith.constant 0 : i32
    %c0_i32_0 = arith.constant 0 : i32
    %c0_i32_1 = arith.constant 0 : i32
    return %c0_i32, %c0_i32_0 : i32, i32
  }
  func.func @transform_4(%arg0: i32) -> (i32, i32) {
    %c0_i32 = arith.constant 0 : i32
    %c0_i32_0 = arith.constant 0 : i32
    %c0_i32_1 = arith.constant 0 : i32
    return %c0_i32, %c0_i32_0 : i32, i32
  }
  func.func @transform_5(%arg0: i32) -> (i32, i32) {
    %c0_i32 = arith.constant 0 : i32
    %c0_i32_0 = arith.constant 0 : i32
    return %arg0, %c0_i32 : i32, i32
  }
}

</mosaic_0001>

<bundles_post_ra>
// kernel: tpu_custom_call.1
= control target key start
LH: loop header
LB: loop body
LE: loop exit
PB: predicated region body
PF: predicated region fallthrough
CT: control target
= control target key end

     0   :  { %10 = vsyncpa [#allocation3], 0  ;;  %s468_s18 = smov [#allocation2]   ;;  %s559_s0 = inlined_call_operand.vmem [shape: bf16[16,16], index: 0, kind: input, shape index: {}]   ;;  %s560_s1 = inlined_call_operand.hbm [shape: f32[16,32], index: 1, kind: input, shape index: {}]   ;;  %s561_s2 = inlined_call_operand.vmem [shape: f32[32,32], index: 2, kind: input, shape index: {}]   ;;  %s562_s3 = inlined_call_operand.vmem [shape: f32[32,2], index: 3, kind: input, shape index: {}]   ;;  %s563_s4 = inlined_call_operand.vmem [shape: f32[3,32], index: 4, kind: input, shape index: {}]   ;;  %s564_s5 = inlined_call_operand.vmem [shape: f32[16,2], index: 5, kind: output, shape index: {}]  }
   0x1   :  { %s18_s19 = sshll.u32 %s468_s18, 4  ;;  %s444_s22 = scalar_lea.hbm %s560_s1, 256  ;;  %s19_s19 = int_to_ptr.vmem [resolvable:$true] %s18_s19 }
   0x2   :  { %p445_p0 = scmp.ne.s32.totalorder %s560_s1, %s444_s22  ;;  %p448_p1 = scmp.lt.u32.totalorder %s444_s22, %s560_s1 }
   0x4   :  { %p450_p2 = pnand %p448_p1, %p445_p0 }
   0x6   :  { %453 = shalt.err (!%p450_p2)
}
   0x7   :  { %s454_s27 = scalar_lea.vmem %s19_s19, 256  ;;  %p459_p4 = scmp.lt.s32.totalorder %s19_s19, %s19_s19 }
   0x8   :  { %p455_p3 = scmp.ne.s32.totalorder %s19_s19, %s454_s27  ;;  %p460_p5 = scmp.lt.s32.totalorder %s454_s27, %s454_s27 }
   0xa   :  { %p461_p6 = por %p460_p5, %p459_p4 }
   0xc   :  { %p462_p7 = pnand %p461_p6, %p455_p3 }
   0xe   :  { %465 = shalt.err (!%p462_p7)
}
   0xf   :  { %s469_s28 = smov 128   ;;  %s470_s29 = smov 8  }
  0x10   :  { %24 = dma.hbm_to_vmem [thread:$0]  %s560_s1, 256, %s19_s19, [#allocation3], %s469_s28, %s469_s28, %s470_s29  }
  0x11   :  { %466 = dma.done.wait [#allocation3], 256  }
  0x12   :  { %467 = vsyncadd [#allocation3], 4294967040  ;;  %v41_v0 = vld [vmem:[#allocation2] sm:$0xff]  ;;  %v42_v1 = vld [vmem:[#allocation2 + $0x8] sm:$0xff]  ;;  %vm47_vm0 = vcmask 130048   ;;  %vm139_vm1 = vcmask 261120   ;;  %v312_v47 = vlaneseq }
  0x13   :  { %v365_v2 = vld [vmem:[%s559_s0] sm:$0xff]   ;;  %v413_v3 = vpack.c.bf16 %v42_v1, %v41_v0  ;;  %v132_v6 = vld [vmem:[%s561_s2 + $0x8] sm:$0xff]  ;;  %v133_v9 = vld [vmem:[%s561_s2 + $0x10] sm:$0xff]  ;;  %vm347_vm7 = vcmask 15360  }
  0x14   :  { %v366_v4 = vunpack.c.l.bf16 %v365_v2  ;;  %v131_v5 = vld [vmem:[%s561_s2] sm:$0xff]  ;;  %v367_v8 = vunpack.c.h.bf16 %v365_v2  ;;  %v134_v10 = vld [vmem:[%s561_s2 + $0x18] sm:$0xff]  ;;  %v224_v13 = vld [vmem:[%s562_s3 + $0x8] sm:$0xff]  ;;  %v313_v53 = vand.u32 127, %v312_v47 }
  0x15   :  { %v417_v7 = vpack.c.bf16 %v132_v6, %v131_v5  ;;  %414 = vmatprep.subr.bf16.mxu0 %v413_v3  ;;  %v421_v11 = vpack.c.bf16 %v134_v10, %v133_v9  ;;  %v223_v12 = vld [vmem:[%s562_s3] sm:$0xff]  ;;  %v225_v22 = vld [vmem:[%s562_s3 + $0x10] sm:$0xff]  ;;  %v226_v23 = vld [vmem:[%s562_s3 + $0x18] sm:$0xff] }
  0x16   :  { %388 = vmatprep.mubr.msk.f32.mxu0 %vm47_vm0, %v366_v4  ;;  %416 = vmatpush3.bf16.msra.mxu0 %v413_v3  ;;  %v425_v14 = vpack.c.bf16 %v224_v13, %v223_v12  ;;  %v355_v15 = vld [vmem:[%s563_s4] ss:$0 sm:$0xff]  ;;  %v429_v24 = vpack.c.bf16 %v226_v23, %v225_v22  ;;  %v358_v25 = vld [vmem:[%s563_s4 + $0x1] ss:$0 sm:$0xff]  ;;  %v361_v32 = vld [vmem:[%s563_s4 + $0x2] ss:$0 sm:$0xff] }
  0x17   :  { %418 = vmatprep.subr.bf16.mxu1 %v417_v7  ;;  %vm344_vm5 = vcmp.ge.s32.totalorder %v313_v53, 1 }
  0x18   :  { %420 = vmatpush3.bf16.msra.mxu1 %v417_v7  ;;  %426 = vmatprep.subr.bf16.mxu0 %v425_v14 }
  0x19   :  { %389 = vmatmul.mubr.msk.f32.vlgmr.msra.gmra.mrb[0].mxu0 %vm47_vm0, %v367_v8  ;;  %422 = vmatprep.subr.bf16.mxu1 %v421_v11 }
  0x1a   :  { %428 = vmatpush3.bf16.msra.mxu0 %v425_v14 }
  0x1b   :  { %430 = vmatprep.subr.bf16.mxu0 %v429_v24 }
  0x1c   :  { %424 = vmatpush3.bf16.msra.mxu1 %v421_v11 }
  0x1e   :  { %432 = vmatpush3.bf16.msra.mxu0 %v429_v24 }
  0xec   :  { %v390_v16 = vpop.f32.mrb[0].mxu0 }
  0xed   :  { %v126_v17 = vadd.f32 %v390_v16, %v355_v15  ;;  %v120_v18 = vpop.f32.mrb[1].mxu0 }
  0xee   :  { %v121_v19 = vadd.f32 %v355_v15, %v120_v18 }
  0xef   :  { %v130_v21 = vmax.f32 %v126_v17, 0.0 }
  0xf0   :  { %v129_v20 = vmax.f32 %v121_v19, 0.0 }
  0xf2   :  { %399 = vmatprep.mubr.msk.f32.mxu1 %vm139_vm1, %v129_v20 }
  0xf3   :  { %400 = vmatmul.mubr.msk.f32.vlgmr.msra.gmra.mrb[0].mxu1 %vm139_vm1, %v130_v21 }
 0x1c6   :  { %v401_v26 = vpop.f32.mrb[0].mxu1 }
 0x1c7   :  { %v218_v27 = vadd.f32 %v401_v26, %v358_v25  ;;  %v212_v28 = vpop.f32.mrb[1].mxu1 }
 0x1c8   :  { %v213_v29 = vadd.f32 %v358_v25, %v212_v28 }
 0x1c9   :  { %v222_v31 = vmax.f32 %v218_v27, 0.0 }
 0x1ca   :  { %v221_v30 = vmax.f32 %v213_v29, 0.0 }
 0x1cc   :  { %410 = vmatprep.mubr.msk.f32.mxu0 %vm139_vm1, %v221_v30 }
 0x1cd   :  { %411 = vmatmul.mubr.msk.f32.vlgmr.msra.gmra.mrb[2].mxu0 %vm139_vm1, %v222_v31 }
 0x2a0   :  { %v412_v33 = vpop.f32.mrb[2].mxu0 }
 0x2a1   :  { %v309_v34 = vadd.f32 %v412_v33, %v361_v32  ;;  %v303_v35 = vpop.f32.mrb[3].mxu0 }
 0x2a2   :  { %v304_v36 = vadd.f32 %v361_v32, %v303_v35 }
 0x2a3   :  { %v317_v37 = vmin.f32 %v309_v34, 20.0  ;;  %vm315_vm3 = vcmp.gt.f32.partialorder %v309_v34, 20.0 }
 0x2a4   :  { %v316_v38 = vmin.f32 %v304_v36, 20.0  ;;  %vm314_vm6 = vcmp.gt.f32.partialorder %v304_v36, 20.0 }
 0x2a5   :  { %v320_v39 = vmul.f32 1.442695, %v317_v37 }
 0x2a6   :  { %v318_v40 = vmul.f32 1.442695, %v316_v38 }
 0x2a7   :  { %436 = vpow2.f32 %v320_v39 }
 0x2a8   :  { %438 = vpow2.f32 %v318_v40 }
 0x2b1   :  { %v437_v41 = vpop.eup %436 }
 0x2b2   :  { %v439_v42 = vpop.eup %438  ;;  %v331_v43 = vadd.f32 1.0, %v437_v41  ;;  %v334_v45 = vmul.f32 -0.5, %v437_v41  ;;  %v337_v49 = vand.u32 2147483647, %v437_v41 }
 0x2b3   :  { %v322_v44 = vadd.f32 1.0, %v439_v42  ;;  %v325_v46 = vmul.f32 -0.5, %v439_v42  ;;  %v328_v51 = vand.u32 2147483647, %v439_v42 }
 0x2b4   :  { %440 = vlog2.f32 %v331_v43  ;;  %v335_v48 = vadd.f32 1.0, %v334_v45  ;;  %vm338_vm2 = vcmp.lt.f32.partialorder %v337_v49, 0.0004427343 }
 0x2b5   :  { %442 = vlog2.f32 %v322_v44  ;;  %v326_v50 = vadd.f32 1.0, %v325_v46  ;;  %vm329_vm4 = vcmp.lt.f32.partialorder %v328_v51, 0.0004427343 }
 0x2b6   :  { %v336_v56 = vmul.f32 %v437_v41, %v335_v48 }
 0x2b7   :  { %v327_v58 = vmul.f32 %v439_v42, %v326_v50 }
 0x2be   :  { %v441_v52 = vpop.eup %440 }
 0x2bf   :  { %v443_v54 = vpop.eup %442  ;;  %v333_v55 = vmul.f32 0.6931472, %v441_v52 }
 0x2c0   :  { %v324_v57 = vmul.f32 0.6931472, %v443_v54 }
 0x2c1   :  { %v339_v59 = vsel %vm338_vm2, %v336_v56, %v333_v55 }
 0x2c2   :  { %v341_v60 = vsel %vm315_vm3, %v309_v34, %v339_v59  ;;  %v330_v61 = vsel %vm329_vm4, %v327_v58, %v324_v57 }
 0x2c3   :  { %v343_v62 = vadd.f32 1e-06, %v341_v60  ;;  %v340_v63 = vsel %vm314_vm6, %v304_v36, %v330_v61 }
 0x2c4   :  { %v342_v0 = vadd.f32 1e-06, %v340_v63 }
 0x2c5   :  { %v346_v1 = vsel %vm344_vm5, %v343_v62, %v309_v34 }
 0x2c6   :  { %349 = vst.msk [vmem:[%s564_s5 + $0x8] sm:$0xff] %vm347_vm7, %v346_v1  ;;  %v345_v2 = vsel %vm344_vm5, %v342_v0, %v304_v36 }
 0x2c7   :  { %348 = vst.msk [vmem:[%s564_s5] sm:$0xff] %vm347_vm7, %v345_v2 }
 0x2c8   :  { %354 = vsyncpa [#allocation3], 1 }

</bundles_post_ra>
